<compile_context>
chip_gen: v7x
topology: tpu7x:2x2x1
jax: 0.10.0
libtpu: 0.0.40
codegen_flags: <defaults>
</compile_context>

<pallas_src>
import jax
import jax.numpy as jnp
from jax import lax
from jax.experimental import pallas as pl
from jax.experimental.pallas import tpu as pltpu

NEG_SLOPE = 0.01     # F.leaky_relu default negative_slope
NORM_EPS = 1e-12     # F.normalize default eps
MASK_VAL = -1e30     # masked (non-edge) attention logit
LANE = 128

_TT = (((1,), (1,)), ((), ()))   # contract last-with-last  : a @ b.T
_TN = (((0,), (0,)), ((), ()))   # contract first-with-first: a.T @ b


def _dot(a, b):
    return jnp.dot(a, b, preferred_element_type=jnp.float32)


def _dotg(a, b, dims):
    return lax.dot_general(a, b, dims, preferred_element_type=jnp.float32)


def _round8(n):
    return ((n + 7) // 8) * 8


# ----------------------------- slab layout ------------------------------

def build_layout(N, input_dim, D, clusters):
    mat, vec, out = {}, {}, {}

    r = 0
    def add_mat(name, rows, cols):
        nonlocal r
        mat[name] = (r, rows, cols)
        r += _round8(rows)
    add_mat("A", N, N)
    add_mat("adj", N, N)
    add_mat("feat", N, input_dim)
    add_mat("f1_W", D, input_dim)
    for i, nc in enumerate(clusters):
        add_mat(f"emb_W{i}", D, D)
        add_mat(f"ass_W{i}", nc, D)
    mat_rows = _round8(r)

    v = 0
    def add_vec(name, cols):
        nonlocal v
        vec[name] = (v, cols)
        v += 1
    add_vec("f1_b", D)
    for i, nc in enumerate(clusters):
        add_vec(f"emb_b{i}", D)
        add_vec(f"ass_b{i}", nc)
        add_vec(f"aw_src{i}", nc)
        add_vec(f"aw_dst{i}", nc)
        add_vec(f"att_b{i}", 1)
    vec_rows = _round8(v)

    o = 0
    def add_out(name, rows, cols):
        nonlocal o
        out[name] = (o, rows, cols)
        o += _round8(rows)
    add_out("x_top", N, D)
    n_cur = N
    for i, nc in enumerate(clusters):
        add_out(f"s{i}", n_cur, nc)
        add_out(f"x{i}", nc, D)
        n_cur = nc
    add_out("mean", 1, 1)
    out_rows = _round8(o)

    return dict(mat=mat, mat_rows=mat_rows, vec=vec, vec_rows=vec_rows,
                out=out, out_rows=out_rows,
                N=N, input_dim=input_dim, D=D, clusters=tuple(clusters))


def pack_inputs(layout, params, A, adj, feature):
    """Host-side one-time packing of all tiny params into 2 lane-dense slabs."""
    mat_slab = jnp.zeros((layout["mat_rows"], LANE), jnp.float32)

    def put(slab, name, val):
        r0, rows, cols = layout["mat"][name]
        return slab.at[r0:r0 + rows, :cols].set(val.astype(jnp.float32))

    mat_slab = put(mat_slab, "A", A)
    mat_slab = put(mat_slab, "adj", adj)
    mat_slab = put(mat_slab, "feat", feature)
    mat_slab = put(mat_slab, "f1_W", params["f1_W"])
    for i, lp in enumerate(params["assign_layers"]):
        mat_slab = put(mat_slab, f"emb_W{i}", lp["emb_W"])
        mat_slab = put(mat_slab, f"ass_W{i}", lp["ass_W"])

    vec_slab = jnp.zeros((layout["vec_rows"], LANE), jnp.float32)

    def putv(slab, name, val):
        r0, cols = layout["vec"][name]
        return slab.at[r0, :cols].set(jnp.asarray(val, jnp.float32).reshape(-1))

    vec_slab = putv(vec_slab, "f1_b", params["f1_b"])
    for i, lp in enumerate(params["assign_layers"]):
        nc = layout["clusters"][i]
        vec_slab = putv(vec_slab, f"emb_b{i}", lp["emb_b"])
        vec_slab = putv(vec_slab, f"ass_b{i}", lp["ass_b"])
        vec_slab = putv(vec_slab, f"aw_src{i}", lp["att_W"][0, :nc])   # src half
        vec_slab = putv(vec_slab, f"aw_dst{i}", lp["att_W"][0, nc:])   # dst half
        vec_slab = putv(vec_slab, f"att_b{i}", lp["att_b"])
    return mat_slab, vec_slab


# ----------------------------- fused kernel ------------------------------

def build_dse1_kernel(layout):
    matL, vecL, outL = layout["mat"], layout["vec"], layout["out"]
    clusters = layout["clusters"]

    def rd_mat(ref, name):
        r0, rows, cols = matL[name]
        return ref[r0:r0 + rows, :cols]

    def rd_vec(ref, name):
        r0, cols = vecL[name]
        return ref[r0:r0 + 1, :cols]

    def wr_out(ref, name, val):
        r0, rows, cols = outL[name]
        ref[r0:r0 + rows, :cols] = val

    def row_softmax(x):
        m = jnp.max(x, axis=-1, keepdims=True)
        p = jnp.exp(x - m)
        return p * pl.reciprocal(jnp.sum(p, axis=-1, keepdims=True), approx=True)

    def linear(x, W, b):                       # x @ W.T + b (no host transpose)
        return _dotg(x, W, _TT) + b

    def mean_agg(At, inv_deg, h):              # DGL copy_u + mean over in-edges
        return _dot(At, h) * inv_deg           # zero in-degree rows are already 0

    def kernel(mat_ref, vec_ref, out_ref):
        out_ref[...] = jnp.zeros_like(out_ref)     # one full lane-dense init store

        # ---- level-0 adjacency prep (shared by GCN_f1 and layer 0) ---------
        At = rd_mat(mat_ref, "A").T                        # (N,N) XLU transpose
        deg = jnp.sum(At, axis=-1, keepdims=True)          # in-degree, lane reduce
        inv_deg = pl.reciprocal(jnp.maximum(deg, 1.0), approx=True)
        adj = rd_mat(mat_ref, "adj")

        # ---- GCN_f1 + F.normalize(p=2, dim=-1) ------------------------------
        h = linear(rd_mat(mat_ref, "feat"), rd_mat(mat_ref, "f1_W"),
                   rd_vec(vec_ref, "f1_b"))
        x = mean_agg(At, inv_deg, h)
        nrm = jnp.sqrt(jnp.sum(x * x, axis=-1, keepdims=True))
        x = x * pl.reciprocal(jnp.maximum(nrm, NORM_EPS), approx=True)
        wr_out(out_ref, "x_top", x)

        # ---- assign layers (statically unrolled, all VMEM resident) ---------
        for li, nc in enumerate(clusters):
            emb_W = rd_mat(mat_ref, f"emb_W{li}")
            ass_W = rd_mat(mat_ref, f"ass_W{li}")
            emb_b = rd_vec(vec_ref, f"emb_b{li}")
            ass_b = rd_vec(vec_ref, f"ass_b{li}")
            aw_src = rd_vec(vec_ref, f"aw_src{li}")
            aw_dst = rd_vec(vec_ref, f"aw_dst{li}")
            att_b = rd_vec(vec_ref, f"att_b{li}")

            # GCN_emb (linear + mean aggregation)
            z = mean_agg(At, inv_deg, linear(x, emb_W, emb_b))

            # GCN_ass (linear + GAT edge-attention aggregation)
            hA = linear(z, ass_W, ass_b)                               # (n, nc)
            dst_s = jnp.sum(hA * aw_dst, axis=-1, keepdims=True)       # (n,1) VPU
            src_r = _dotg(aw_src, hA, _TT)                             # (1,n)
            e = dst_s + src_r + att_b                   # e[v,u]: logit of edge u->v
            e = jnp.where(e > 0, e, NEG_SLOPE * e)      # F.leaky_relu
            e = jnp.where(At > 0, e, MASK_VAL)          # real in-edges only
            alpha = row_softmax(e)                      # softmax over incoming edges
            s_raw = _dot(alpha, hA)

            s = row_softmax(s_raw)                      # torch.softmax(s, dim=-1)
            x = _dotg(s, z, _TN)                        # s.T @ z          (nc, D)
            adj_s = _dot(_dotg(s, adj, _TN), s)         # s.T @ adj @ s    (nc, nc)

            rr = lax.broadcasted_iota(jnp.int32, (nc, nc), 0)
            cc = lax.broadcasted_iota(jnp.int32, (nc, nc), 1)
            offdiag = rr != cc
            adj_s = jnp.where(offdiag, adj_s, 0.0)      # setdiag(0)

            wr_out(out_ref, f"s{li}", s)
            wr_out(out_ref, f"x{li}", x)

            if li + 1 < len(clusters):
                # next graph = structure(adj_s) + self loops (transposed view),
                # with degree / reciprocal hoisted for reuse.
                At = jnp.where(offdiag,
                               (adj_s.T != 0.0).astype(jnp.float32), 1.0)
                deg = jnp.sum(At, axis=-1, keepdims=True)
                inv_deg = pl.reciprocal(jnp.maximum(deg, 1.0), approx=True)
                adj = adj_s

        # ---- tree_node_embed[0] = torch.mean(x) -----------------------------
        total = jnp.sum(jnp.sum(x, axis=-1, keepdims=True), axis=0, keepdims=True)
        wr_out(out_ref, "mean", total * (1.0 / float(x.shape[0] * x.shape[1])))

    return kernel


def _rough_cost(layout):
    N, D, ind = layout["N"], layout["D"], layout["input_dim"]
    flops = 2 * N * ind * D + 2 * N * N * D
    trans = N * D
    n = N
    for nc in layout["clusters"]:
        flops += 2 * n * D * D + 2 * n * n * D            # emb linear + mean agg
        flops += 2 * n * D * nc + 2 * n * n * nc          # ass linear + att agg
        flops += 2 * n * nc * D                           # s.T @ z
        flops += 2 * nc * n * n + 2 * nc * n * nc         # s.T @ adj @ s
        trans += n * n + n * nc
        n = nc
    bytes_accessed = 4 * LANE * (layout["mat_rows"] + layout["vec_rows"]
                                 + layout["out_rows"])
    return pl.CostEstimate(flops=int(flops), transcendentals=int(trans),
                           bytes_accessed=int(bytes_accessed))


# ----------------------------- forward wrapper ------------------------------

def hard_assign(assignmatrix, height, num_nodes):
    # DSE1.hard — tiny bookkeeping matmuls / argmax; plain XLA is cheaper than
    # extra pallas launches for this.
    assign_mat = {height: jnp.eye(num_nodes, dtype=jnp.float32)}
    for k in range(height - 1, 0, -1):
        assign_mat[k] = jnp.dot(assign_mat[k + 1], assignmatrix[k + 1])
    assignment = {}
    for h, a in assign_mat.items():
        idx = jnp.argmax(a, axis=1)
        assignment[h] = jax.nn.one_hot(idx, a.shape[1], dtype=a.dtype)
    return assignment


def make_dse1_forward(layout, height, num_nodes):
    kernel = build_dse1_kernel(layout)
    fused = pl.pallas_call(
        kernel,
        out_shape=jax.ShapeDtypeStruct((layout["out_rows"], LANE), jnp.float32),
        in_specs=[pl.BlockSpec(memory_space=pltpu.MemorySpace.VMEM),
                  pl.BlockSpec(memory_space=pltpu.MemorySpace.VMEM)],
        out_specs=pl.BlockSpec(memory_space=pltpu.MemorySpace.VMEM),
        cost_estimate=_rough_cost(layout),
        compiler_params=pltpu.CompilerParams(vmem_limit_bytes=16 * 1024 * 1024),
    )
    clusters = layout["clusters"]

    def forward(mat_slab, vec_slab):
        out = fused(mat_slab, vec_slab)

        def get(name):
            r0, rows, cols = layout["out"][name]
            return out[r0:r0 + rows, :cols]

        tree_node_embed = {height: get("x_top")}
        assignmatrix = {}
        for i in range(len(clusters)):
            assignmatrix[height - i] = get(f"s{i}")
            tree_node_embed[height - i - 1] = get(f"x{i}")
        tree_node_embed[0] = get("mean")[0, 0]
        assignmatrix[1] = jnp.ones((clusters[-1], 1), jnp.float32)

        hard = hard_assign(assignmatrix, height, num_nodes)
        return assignmatrix, tree_node_embed, hard

    return forward


# ----------------------------- deterministic init ------------------------------

def init_linear(key, in_dim, out_dim):
    kw, kb = jax.random.split(key)
    bound = 1.0 / (in_dim ** 0.5)          # matches nn.Linear default bound
    W = jax.random.uniform(kw, (out_dim, in_dim), jnp.float32, -bound, bound)
    b = jax.random.uniform(kb, (out_dim,), jnp.float32, -bound, bound)
    return W, b


def init_params(key, input_dim, embed_dim, num_clusters_layer):
    keys = jax.random.split(key, 1 + 3 * len(num_clusters_layer))
    f1_W, f1_b = init_linear(keys[0], input_dim, embed_dim)
    layers = []
    ki = 1
    for nc in num_clusters_layer:
        emb_W, emb_b = init_linear(keys[ki], embed_dim, embed_dim); ki += 1
        ass_W, ass_b = init_linear(keys[ki], embed_dim, nc); ki += 1
        att_W, att_b = init_linear(keys[ki], 2 * nc, 1); ki += 1
        layers.append(dict(emb_W=emb_W, emb_b=emb_b, ass_W=ass_W, ass_b=ass_b,
                           att_W=att_W, att_b=att_b))
    return dict(f1_W=f1_W, f1_b=f1_b, assign_layers=layers)


if __name__ == "__main__":
    key = jax.random.PRNGKey(0)
    k_adj, k_feat, k_param = jax.random.split(key, 3)

    N = 16               # num_nodes
    input_dim = 12
    embed_dim = 32
    height = 3
    num_clusters_layer = [8, 4]

    # deterministic symmetric graph; `adj` has no self loops, the DGL graph `A` does.
    rand = jax.random.bernoulli(k_adj, 0.3, (N, N)).astype(jnp.float32)
    adj = jnp.maximum(rand, rand.T) * (1.0 - jnp.eye(N, dtype=jnp.float32))
    A = jnp.maximum(adj, jnp.eye(N, dtype=jnp.float32))

    feature = jax.random.normal(k_feat, (N, input_dim), dtype=jnp.float32)
    params = init_params(k_param, input_dim, embed_dim, num_clusters_layer)

    layout = build_layout(N, input_dim, embed_dim, num_clusters_layer)
    mat_slab, vec_slab = pack_inputs(layout, params, A, adj, feature)   # once

    forward = jax.jit(make_dse1_forward(layout, height, N))
    assignmatrix, tree_node_embed, hard = forward(mat_slab, vec_slab)

    jax.block_until_ready((assignmatrix, tree_node_embed, hard))
    print("KERNEL_OK")
</pallas_src>

<mosaic_0001>
module attributes {stable_mosaic.version = 11 : i64} {
  func.func @kernel(%arg0: memref<160x128xf32, #tpu.memory_space<vmem>>, %arg1: memref<16x128xf32, #tpu.memory_space<vmem>>, %arg2: memref<64x128xf32, #tpu.memory_space<vmem>>) attributes {dimension_semantics = [], scalar_prefetch = 0 : i64, scratch_operands = 0 : i64, tpu.core_type = #tpu.core_type<tc>} {
    %cst = arith.constant 0.000000e+00 : f32
    %0 = vector.broadcast %cst : f32 to vector<64x128xf32>
    %c0 = arith.constant 0 : index
    %c0_0 = arith.constant 0 : index
    %1 = vector.load %arg2[%c0, %c0_0] : memref<64x128xf32, #tpu.memory_space<vmem>>, vector<64x128xf32>
    tpu.vector_store %arg2[%c0, %c0_0], %0 {strides = array<i32>} : memref<64x128xf32, #tpu.memory_space<vmem>>, vector<64x128xf32>,
    %c0_1 = arith.constant 0 : index
    %c0_2 = arith.constant 0 : index
    %2 = vector.load %arg0[%c0_1, %c0_2] : memref<160x128xf32, #tpu.memory_space<vmem>>, vector<16x16xf32>
    %3 = tpu.transpose %2, [1, 0] : vector<16x16xf32> -> vector<16x16xf32>
    %cst_3 = arith.constant dense<0.000000e+00> : vector<16xf32>
    %4 = vector.multi_reduction <add>, %3, %cst_3 [1] : vector<16x16xf32> to vector<16xf32>
    %5 = vector.shape_cast %4 : vector<16xf32> to vector<16x1xf32>
    %cst_4 = arith.constant 1.000000e+00 : f32
    %6 = vector.broadcast %cst_4 : f32 to vector<16x1xf32>
    %7 = arith.maximumf %5, %6 : vector<16x1xf32>
    %8 = tpu.reciprocal %7 {approx = true} : vector<16x1xf32> -> vector<16x1xf32>
    %c16 = arith.constant 16 : index
    %c0_5 = arith.constant 0 : index
    %9 = vector.load %arg0[%c16, %c0_5] : memref<160x128xf32, #tpu.memory_space<vmem>>, vector<16x16xf32>
    %c32 = arith.constant 32 : index
    %c0_6 = arith.constant 0 : index
    %10 = vector.load %arg0[%c32, %c0_6] : memref<160x128xf32, #tpu.memory_space<vmem>>, vector<16x12xf32>
    %c48 = arith.constant 48 : index
    %c0_7 = arith.constant 0 : index
    %11 = vector.load %arg0[%c48, %c0_7] : memref<160x128xf32, #tpu.memory_space<vmem>>, vector<32x12xf32>
    %c0_8 = arith.constant 0 : index
    %c0_9 = arith.constant 0 : index
    %12 = vector.load %arg1[%c0_8, %c0_9] : memref<16x128xf32, #tpu.memory_space<vmem>>, vector<1x32xf32>
    %cst_10 = arith.constant dense<0.000000e+00> : vector<16x32xf32>
    %13 = tpu.matmul %10, %11, %cst_10 {dimension_numbers = #tpu.dot_dimension_numbers<[1], [1], [0], [0], [0, 0, 1, 0], [], []>} : vector<16x12xf32>, vector<32x12xf32>, vector<16x32xf32> -> vector<16x32xf32>
    %14 = vector.broadcast %12 : vector<1x32xf32> to vector<16x32xf32>
    %15 = arith.addf %13, %14 : vector<16x32xf32>
    %cst_11 = arith.constant dense<0.000000e+00> : vector<16x32xf32>
    %16 = tpu.matmul %3, %15, %cst_11 {dimension_numbers = #tpu.dot_dimension_numbers<[1], [0], [0], [1], [0, 0, 1, 1], [], []>} : vector<16x16xf32>, vector<16x32xf32>, vector<16x32xf32> -> vector<16x32xf32>
    %17 = vector.broadcast %8 : vector<16x1xf32> to vector<16x32xf32>
    %18 = arith.mulf %16, %17 : vector<16x32xf32>
    %19 = arith.mulf %18, %18 : vector<16x32xf32>
    %cst_12 = arith.constant dense<0.000000e+00> : vector<16xf32>
    %20 = vector.multi_reduction <add>, %19, %cst_12 [1] : vector<16x32xf32> to vector<16xf32>
    %21 = vector.shape_cast %20 : vector<16xf32> to vector<16x1xf32>
    %22 = math.sqrt %21 : vector<16x1xf32>
    %cst_13 = arith.constant 9.99999996E-13 : f32
    %23 = vector.broadcast %cst_13 : f32 to vector<16x1xf32>
    %24 = arith.maximumf %22, %23 : vector<16x1xf32>
    %25 = tpu.reciprocal %24 {approx = true} : vector<16x1xf32> -> vector<16x1xf32>
    %26 = vector.broadcast %25 : vector<16x1xf32> to vector<16x32xf32>
    %27 = arith.mulf %18, %26 : vector<16x32xf32>
    %c0_14 = arith.constant 0 : index
    %c0_15 = arith.constant 0 : index
    %28 = vector.load %arg2[%c0_14, %c0_15] : memref<64x128xf32, #tpu.memory_space<vmem>>, vector<16x32xf32>
    tpu.vector_store %arg2[%c0_14, %c0_15], %27 {strides = array<i32>} : memref<64x128xf32, #tpu.memory_space<vmem>>, vector<16x32xf32>,
    %c80 = arith.constant 80 : index
    %c0_16 = arith.constant 0 : index
    %29 = vector.load %arg0[%c80, %c0_16] : memref<160x128xf32, #tpu.memory_space<vmem>>, vector<32x32xf32>
    %c112 = arith.constant 112 : index
    %c0_17 = arith.constant 0 : index
    %30 = vector.load %arg0[%c112, %c0_17] : memref<160x128xf32, #tpu.memory_space<vmem>>, vector<8x32xf32>
    %c1 = arith.constant 1 : index
    %c0_18 = arith.constant 0 : index
    %31 = vector.load %arg1[%c1, %c0_18] : memref<16x128xf32, #tpu.memory_space<vmem>>, vector<1x32xf32>
    %c2 = arith.constant 2 : index
    %c0_19 = arith.constant 0 : index
    %32 = vector.load %arg1[%c2, %c0_19] : memref<16x128xf32, #tpu.memory_space<vmem>>, vector<1x8xf32>
    %c3 = arith.constant 3 : index
    %c0_20 = arith.constant 0 : index
    %33 = vector.load %arg1[%c3, %c0_20] : memref<16x128xf32, #tpu.memory_space<vmem>>, vector<1x8xf32>
    %c4 = arith.constant 4 : index
    %c0_21 = arith.constant 0 : index
    %34 = vector.load %arg1[%c4, %c0_21] : memref<16x128xf32, #tpu.memory_space<vmem>>, vector<1x8xf32>
    %c5 = arith.constant 5 : index
    %c0_22 = arith.constant 0 : index
    %35 = vector.load %arg1[%c5, %c0_22] : memref<16x128xf32, #tpu.memory_space<vmem>>, vector<1x1xf32>
    %cst_23 = arith.constant dense<0.000000e+00> : vector<16x32xf32>
    %36 = tpu.matmul %27, %29, %cst_23 {dimension_numbers = #tpu.dot_dimension_numbers<[1], [1], [0], [0], [0, 0, 1, 0], [], []>} : vector<16x32xf32>, vector<32x32xf32>, vector<16x32xf32> -> vector<16x32xf32>
    %37 = vector.broadcast %31 : vector<1x32xf32> to vector<16x32xf32>
    %38 = arith.addf %36, %37 : vector<16x32xf32>
    %cst_24 = arith.constant dense<0.000000e+00> : vector<16x32xf32>
    %39 = tpu.matmul %3, %38, %cst_24 {dimension_numbers = #tpu.dot_dimension_numbers<[1], [0], [0], [1], [0, 0, 1, 1], [], []>} : vector<16x16xf32>, vector<16x32xf32>, vector<16x32xf32> -> vector<16x32xf32>
    %40 = vector.broadcast %8 : vector<16x1xf32> to vector<16x32xf32>
    %41 = arith.mulf %39, %40 : vector<16x32xf32>
    %cst_25 = arith.constant dense<0.000000e+00> : vector<16x8xf32>
    %42 = tpu.matmul %41, %30, %cst_25 {dimension_numbers = #tpu.dot_dimension_numbers<[1], [1], [0], [0], [0, 0, 1, 0], [], []>} : vector<16x32xf32>, vector<8x32xf32>, vector<16x8xf32> -> vector<16x8xf32>
    %43 = vector.broadcast %32 : vector<1x8xf32> to vector<16x8xf32>
    %44 = arith.addf %42, %43 : vector<16x8xf32>
    %45 = vector.broadcast %34 : vector<1x8xf32> to vector<16x8xf32>
    %46 = arith.mulf %44, %45 : vector<16x8xf32>
    %cst_26 = arith.constant dense<0.000000e+00> : vector<16xf32>
    %47 = vector.multi_reduction <add>, %46, %cst_26 [1] : vector<16x8xf32> to vector<16xf32>
    %48 = vector.shape_cast %47 : vector<16xf32> to vector<16x1xf32>
    %cst_27 = arith.constant dense<0.000000e+00> : vector<1x16xf32>
    %49 = tpu.matmul %33, %44, %cst_27 {dimension_numbers = #tpu.dot_dimension_numbers<[1], [1], [0], [0], [0, 0, 1, 0], [], []>} : vector<1x8xf32>, vector<16x8xf32>, vector<1x16xf32> -> vector<1x16xf32>
    %50 = vector.broadcast %48 : vector<16x1xf32> to vector<16x16xf32>
    %51 = vector.broadcast %49 : vector<1x16xf32> to vector<16x16xf32>
    %52 = arith.addf %50, %51 : vector<16x16xf32>
    %53 = vector.broadcast %35 : vector<1x1xf32> to vector<16x16xf32>
    %54 = arith.addf %52, %53 : vector<16x16xf32>
    %cst_28 = arith.constant 0.000000e+00 : f32
    %55 = vector.broadcast %cst_28 : f32 to vector<16x16xf32>
    %56 = arith.cmpf ogt, %54, %55 : vector<16x16xf32>
    %cst_29 = arith.constant 0.00999999977 : f32
    %57 = vector.broadcast %cst_29 : f32 to vector<16x16xf32>
    %58 = arith.mulf %57, %54 : vector<16x16xf32>
    %59 = arith.select %56, %54, %58 : vector<16x16xi1>, vector<16x16xf32>
    %cst_30 = arith.constant 0.000000e+00 : f32
    %60 = vector.broadcast %cst_30 : f32 to vector<16x16xf32>
    %61 = arith.cmpf ogt, %3, %60 : vector<16x16xf32>
    %cst_31 = arith.constant -1.000000e+30 : f32
    %62 = vector.broadcast %cst_31 : f32 to vector<16x16xf32>
    %63 = arith.select %61, %59, %62 : vector<16x16xi1>, vector<16x16xf32>
    %cst_32 = arith.constant dense<0xFF800000> : vector<16xf32>
    %64 = vector.multi_reduction <maximumf>, %63, %cst_32 [1] : vector<16x16xf32> to vector<16xf32>
    %65 = vector.shape_cast %64 : vector<16xf32> to vector<16x1xf32>
    %66 = vector.broadcast %65 : vector<16x1xf32> to vector<16x16xf32>
    %67 = arith.subf %63, %66 : vector<16x16xf32>
    %68 = math.exp %67 : vector<16x16xf32>
    %cst_33 = arith.constant dense<0.000000e+00> : vector<16xf32>
    %69 = vector.multi_reduction <add>, %68, %cst_33 [1] : vector<16x16xf32> to vector<16xf32>
    %70 = vector.shape_cast %69 : vector<16xf32> to vector<16x1xf32>
    %71 = tpu.reciprocal %70 {approx = true} : vector<16x1xf32> -> vector<16x1xf32>
    %72 = vector.broadcast %71 : vector<16x1xf32> to vector<16x16xf32>
    %73 = arith.mulf %68, %72 : vector<16x16xf32>
    %cst_34 = arith.constant dense<0.000000e+00> : vector<16x8xf32>
    %74 = tpu.matmul %73, %44, %cst_34 {dimension_numbers = #tpu.dot_dimension_numbers<[1], [0], [0], [1], [0, 0, 1, 1], [], []>} : vector<16x16xf32>, vector<16x8xf32>, vector<16x8xf32> -> vector<16x8xf32>
    %cst_35 = arith.constant dense<0xFF800000> : vector<16xf32>
    %75 = vector.multi_reduction <maximumf>, %74, %cst_35 [1] : vector<16x8xf32> to vector<16xf32>
    %76 = vector.shape_cast %75 : vector<16xf32> to vector<16x1xf32>
    %77 = vector.broadcast %76 : vector<16x1xf32> to vector<16x8xf32>
    %78 = arith.subf %74, %77 : vector<16x8xf32>
    %79 = math.exp %78 : vector<16x8xf32>
    %cst_36 = arith.constant dense<0.000000e+00> : vector<16xf32>
    %80 = vector.multi_reduction <add>, %79, %cst_36 [1] : vector<16x8xf32> to vector<16xf32>
    %81 = vector.shape_cast %80 : vector<16xf32> to vector<16x1xf32>
    %82 = tpu.reciprocal %81 {approx = true} : vector<16x1xf32> -> vector<16x1xf32>
    %83 = vector.broadcast %82 : vector<16x1xf32> to vector<16x8xf32>
    %84 = arith.mulf %79, %83 : vector<16x8xf32>
    %cst_37 = arith.constant dense<0.000000e+00> : vector<8x32xf32>
    %85 = tpu.matmul %84, %41, %cst_37 {dimension_numbers = #tpu.dot_dimension_numbers<[0], [0], [1], [1], [0, 1, 1, 1], [], []>} : vector<16x8xf32>, vector<16x32xf32>, vector<8x32xf32> -> vector<8x32xf32>
    %cst_38 = arith.constant dense<0.000000e+00> : vector<8x16xf32>
    %86 = tpu.matmul %84, %9, %cst_38 {dimension_numbers = #tpu.dot_dimension_numbers<[0], [0], [1], [1], [0, 1, 1, 1], [], []>} : vector<16x8xf32>, vector<16x16xf32>, vector<8x16xf32> -> vector<8x16xf32>
    %cst_39 = arith.constant dense<0.000000e+00> : vector<8x8xf32>
    %87 = tpu.matmul %86, %84, %cst_39 {dimension_numbers = #tpu.dot_dimension_numbers<[1], [0], [0], [1], [0, 0, 1, 1], [], []>} : vector<8x16xf32>, vector<16x8xf32>, vector<8x8xf32> -> vector<8x8xf32>
    %88 = tpu.iota {dimensions = array<i32: 0>} : vector<8x8xi32>
    %89 = tpu.iota {dimensions = array<i32: 1>} : vector<8x8xi32>
    %90 = arith.cmpi ne, %88, %89 : vector<8x8xi32>
    %cst_40 = arith.constant 0.000000e+00 : f32
    %91 = vector.broadcast %cst_40 : f32 to vector<8x8xf32>
    %92 = arith.select %90, %87, %91 : vector<8x8xi1>, vector<8x8xf32>
    %c16_41 = arith.constant 16 : index
    %c0_42 = arith.constant 0 : index
    %93 = vector.load %arg2[%c16_41, %c0_42] : memref<64x128xf32, #tpu.memory_space<vmem>>, vector<16x8xf32>
    tpu.vector_store %arg2[%c16_41, %c0_42], %84 {strides = array<i32>} : memref<64x128xf32, #tpu.memory_space<vmem>>, vector<16x8xf32>,
    %c32_43 = arith.constant 32 : index
    %c0_44 = arith.constant 0 : index
    %94 = vector.load %arg2[%c32_43, %c0_44] : memref<64x128xf32, #tpu.memory_space<vmem>>, vector<8x32xf32>
    tpu.vector_store %arg2[%c32_43, %c0_44], %85 {strides = array<i32>} : memref<64x128xf32, #tpu.memory_space<vmem>>, vector<8x32xf32>,
    %95 = tpu.transpose %92, [1, 0] : vector<8x8xf32> -> vector<8x8xf32>
    %cst_45 = arith.constant 0.000000e+00 : f32
    %96 = vector.broadcast %cst_45 : f32 to vector<8x8xf32>
    %97 = arith.cmpf one, %95, %96 : vector<8x8xf32>
    %98 = arith.extui %97 : vector<8x8xi1> to vector<8x8xi32>
    %99 = arith.sitofp %98 : vector<8x8xi32> to vector<8x8xf32>
    %cst_46 = arith.constant 1.000000e+00 : f32
    %100 = vector.broadcast %cst_46 : f32 to vector<8x8xf32>
    %101 = arith.select %90, %99, %100 : vector<8x8xi1>, vector<8x8xf32>
    %cst_47 = arith.constant dense<0.000000e+00> : vector<8xf32>
    %102 = vector.multi_reduction <add>, %101, %cst_47 [1] : vector<8x8xf32> to vector<8xf32>
    %103 = vector.shape_cast %102 : vector<8xf32> to vector<8x1xf32>
    %cst_48 = arith.constant 1.000000e+00 : f32
    %104 = vector.broadcast %cst_48 : f32 to vector<8x1xf32>
    %105 = arith.maximumf %103, %104 : vector<8x1xf32>
    %106 = tpu.reciprocal %105 {approx = true} : vector<8x1xf32> -> vector<8x1xf32>
    %c120 = arith.constant 120 : index
    %c0_49 = arith.constant 0 : index
    %107 = vector.load %arg0[%c120, %c0_49] : memref<160x128xf32, #tpu.memory_space<vmem>>, vector<32x32xf32>
    %c152 = arith.constant 152 : index
    %c0_50 = arith.constant 0 : index
    %108 = vector.load %arg0[%c152, %c0_50] : memref<160x128xf32, #tpu.memory_space<vmem>>, vector<4x32xf32>
    %c6 = arith.constant 6 : index
    %c0_51 = arith.constant 0 : index
    %109 = vector.load %arg1[%c6, %c0_51] : memref<16x128xf32, #tpu.memory_space<vmem>>, vector<1x32xf32>
    %c7 = arith.constant 7 : index
    %c0_52 = arith.constant 0 : index
    %110 = vector.load %arg1[%c7, %c0_52] : memref<16x128xf32, #tpu.memory_space<vmem>>, vector<1x4xf32>
    %c8 = arith.constant 8 : index
    %c0_53 = arith.constant 0 : index
    %111 = vector.load %arg1[%c8, %c0_53] : memref<16x128xf32, #tpu.memory_space<vmem>>, vector<1x4xf32>
    %c9 = arith.constant 9 : index
    %c0_54 = arith.constant 0 : index
    %112 = vector.load %arg1[%c9, %c0_54] : memref<16x128xf32, #tpu.memory_space<vmem>>, vector<1x4xf32>
    %c10 = arith.constant 10 : index
    %c0_55 = arith.constant 0 : index
    %113 = vector.load %arg1[%c10, %c0_55] : memref<16x128xf32, #tpu.memory_space<vmem>>, vector<1x1xf32>
    %cst_56 = arith.constant dense<0.000000e+00> : vector<8x32xf32>
    %114 = tpu.matmul %85, %107, %cst_56 {dimension_numbers = #tpu.dot_dimension_numbers<[1], [1], [0], [0], [0, 0, 1, 0], [], []>} : vector<8x32xf32>, vector<32x32xf32>, vector<8x32xf32> -> vector<8x32xf32>
    %115 = vector.broadcast %109 : vector<1x32xf32> to vector<8x32xf32>
    %116 = arith.addf %114, %115 : vector<8x32xf32>
    %cst_57 = arith.constant dense<0.000000e+00> : vector<8x32xf32>
    %117 = tpu.matmul %101, %116, %cst_57 {dimension_numbers = #tpu.dot_dimension_numbers<[1], [0], [0], [1], [0, 0, 1, 1], [], []>} : vector<8x8xf32>, vector<8x32xf32>, vector<8x32xf32> -> vector<8x32xf32>
    %118 = vector.broadcast %106 : vector<8x1xf32> to vector<8x32xf32>
    %119 = arith.mulf %117, %118 : vector<8x32xf32>
    %cst_58 = arith.constant dense<0.000000e+00> : vector<8x4xf32>
    %120 = tpu.matmul %119, %108, %cst_58 {dimension_numbers = #tpu.dot_dimension_numbers<[1], [1], [0], [0], [0, 0, 1, 0], [], []>} : vector<8x32xf32>, vector<4x32xf32>, vector<8x4xf32> -> vector<8x4xf32>
    %121 = vector.broadcast %110 : vector<1x4xf32> to vector<8x4xf32>
    %122 = arith.addf %120, %121 : vector<8x4xf32>
    %123 = vector.broadcast %112 : vector<1x4xf32> to vector<8x4xf32>
    %124 = arith.mulf %122, %123 : vector<8x4xf32>
    %cst_59 = arith.constant dense<0.000000e+00> : vector<8xf32>
    %125 = vector.multi_reduction <add>, %124, %cst_59 [1] : vector<8x4xf32> to vector<8xf32>
    %126 = vector.shape_cast %125 : vector<8xf32> to vector<8x1xf32>
    %cst_60 = arith.constant dense<0.000000e+00> : vector<1x8xf32>
    %127 = tpu.matmul %111, %122, %cst_60 {dimension_numbers = #tpu.dot_dimension_numbers<[1], [1], [0], [0], [0, 0, 1, 0], [], []>} : vector<1x4xf32>, vector<8x4xf32>, vector<1x8xf32> -> vector<1x8xf32>
    %128 = vector.broadcast %126 : vector<8x1xf32> to vector<8x8xf32>
    %129 = vector.broadcast %127 : vector<1x8xf32> to vector<8x8xf32>
    %130 = arith.addf %128, %129 : vector<8x8xf32>
    %131 = vector.broadcast %113 : vector<1x1xf32> to vector<8x8xf32>
    %132 = arith.addf %130, %131 : vector<8x8xf32>
    %cst_61 = arith.constant 0.000000e+00 : f32
    %133 = vector.broadcast %cst_61 : f32 to vector<8x8xf32>
    %134 = arith.cmpf ogt, %132, %133 : vector<8x8xf32>
    %cst_62 = arith.constant 0.00999999977 : f32
    %135 = vector.broadcast %cst_62 : f32 to vector<8x8xf32>
    %136 = arith.mulf %135, %132 : vector<8x8xf32>
    %137 = arith.select %134, %132, %136 : vector<8x8xi1>, vector<8x8xf32>
    %cst_63 = arith.constant 0.000000e+00 : f32
    %138 = vector.broadcast %cst_63 : f32 to vector<8x8xf32>
    %139 = arith.cmpf ogt, %101, %138 : vector<8x8xf32>
    %cst_64 = arith.constant -1.000000e+30 : f32
    %140 = vector.broadcast %cst_64 : f32 to vector<8x8xf32>
    %141 = arith.select %139, %137, %140 : vector<8x8xi1>, vector<8x8xf32>
    %cst_65 = arith.constant dense<0xFF800000> : vector<8xf32>
    %142 = vector.multi_reduction <maximumf>, %141, %cst_65 [1] : vector<8x8xf32> to vector<8xf32>
    %143 = vector.shape_cast %142 : vector<8xf32> to vector<8x1xf32>
    %144 = vector.broadcast %143 : vector<8x1xf32> to vector<8x8xf32>
    %145 = arith.subf %141, %144 : vector<8x8xf32>
    %146 = math.exp %145 : vector<8x8xf32>
    %cst_66 = arith.constant dense<0.000000e+00> : vector<8xf32>
    %147 = vector.multi_reduction <add>, %146, %cst_66 [1] : vector<8x8xf32> to vector<8xf32>
    %148 = vector.shape_cast %147 : vector<8xf32> to vector<8x1xf32>
    %149 = tpu.reciprocal %148 {approx = true} : vector<8x1xf32> -> vector<8x1xf32>
    %150 = vector.broadcast %149 : vector<8x1xf32> to vector<8x8xf32>
    %151 = arith.mulf %146, %150 : vector<8x8xf32>
    %cst_67 = arith.constant dense<0.000000e+00> : vector<8x4xf32>
    %152 = tpu.matmul %151, %122, %cst_67 {dimension_numbers = #tpu.dot_dimension_numbers<[1], [0], [0], [1], [0, 0, 1, 1], [], []>} : vector<8x8xf32>, vector<8x4xf32>, vector<8x4xf32> -> vector<8x4xf32>
    %cst_68 = arith.constant dense<0xFF800000> : vector<8xf32>
    %153 = vector.multi_reduction <maximumf>, %152, %cst_68 [1] : vector<8x4xf32> to vector<8xf32>
    %154 = vector.shape_cast %153 : vector<8xf32> to vector<8x1xf32>
    %155 = vector.broadcast %154 : vector<8x1xf32> to vector<8x4xf32>
    %156 = arith.subf %152, %155 : vector<8x4xf32>
    %157 = math.exp %156 : vector<8x4xf32>
    %cst_69 = arith.constant dense<0.000000e+00> : vector<8xf32>
    %158 = vector.multi_reduction <add>, %157, %cst_69 [1] : vector<8x4xf32> to vector<8xf32>
    %159 = vector.shape_cast %158 : vector<8xf32> to vector<8x1xf32>
    %160 = tpu.reciprocal %159 {approx = true} : vector<8x1xf32> -> vector<8x1xf32>
    %161 = vector.broadcast %160 : vector<8x1xf32> to vector<8x4xf32>
    %162 = arith.mulf %157, %161 : vector<8x4xf32>
    %cst_70 = arith.constant dense<0.000000e+00> : vector<4x32xf32>
    %163 = tpu.matmul %162, %119, %cst_70 {dimension_numbers = #tpu.dot_dimension_numbers<[0], [0], [1], [1], [0, 1, 1, 1], [], []>} : vector<8x4xf32>, vector<8x32xf32>, vector<4x32xf32> -> vector<4x32xf32>
    %c40 = arith.constant 40 : index
    %c0_71 = arith.constant 0 : index
    %164 = vector.load %arg2[%c40, %c0_71] : memref<64x128xf32, #tpu.memory_space<vmem>>, vector<8x4xf32>
    tpu.vector_store %arg2[%c40, %c0_71], %162 {strides = array<i32>} : memref<64x128xf32, #tpu.memory_space<vmem>>, vector<8x4xf32>,
    %c48_72 = arith.constant 48 : index
    %c0_73 = arith.constant 0 : index
    %165 = vector.load %arg2[%c48_72, %c0_73] : memref<64x128xf32, #tpu.memory_space<vmem>>, vector<4x32xf32>
    tpu.vector_store %arg2[%c48_72, %c0_73], %163 {strides = array<i32>} : memref<64x128xf32, #tpu.memory_space<vmem>>, vector<4x32xf32>,
    %cst_74 = arith.constant dense<0.000000e+00> : vector<4xf32>
    %166 = vector.multi_reduction <add>, %163, %cst_74 [1] : vector<4x32xf32> to vector<4xf32>
    %167 = vector.shape_cast %166 : vector<4xf32> to vector<4x1xf32>
    %cst_75 = arith.constant dense<0.000000e+00> : vector<1xf32>
    %168 = vector.multi_reduction <add>, %167, %cst_75 [0] : vector<4x1xf32> to vector<1xf32>
    %169 = vector.shape_cast %168 : vector<1xf32> to vector<1x1xf32>
    %cst_76 = arith.constant 7.812500e-03 : f32
    %170 = vector.broadcast %cst_76 : f32 to vector<1x1xf32>
    %171 = arith.mulf %169, %170 : vector<1x1xf32>
    %c56 = arith.constant 56 : index
    %c0_77 = arith.constant 0 : index
    %172 = vector.load %arg2[%c56, %c0_77] : memref<64x128xf32, #tpu.memory_space<vmem>>, vector<1x1xf32>
    tpu.vector_store %arg2[%c56, %c0_77], %171 {strides = array<i32>} : memref<64x128xf32, #tpu.memory_space<vmem>>, vector<1x1xf32>,
    return
  }
}

</mosaic_0001>

<bundles_post_ra>
// kernel: forward.1
= control target key start
LH: loop header
LB: loop body
LE: loop exit
PB: predicated region body
PF: predicated region fallthrough
CT: control target
= control target key end

     0   :  { %7 = vsyncpa [#allocation3], 0  ;;  %s2326_s0 = inlined_call_operand.hbm [shape: f32[160,128], index: 0, kind: input, shape index: {}]   ;;  %s2327_s1 = inlined_call_operand.hbm [shape: f32[16,128], index: 1, kind: input, shape index: {}]   ;;  %s2328_s2 = inlined_call_operand.vmem [shape: f32[64,128], index: 2, kind: output, shape index: {}]  }
   0x1   :  { %8 = vsyncpa [#allocation5], 0  ;;  %s2065_s9 = smov [#allocation2]   ;;  %s2017_s13 = scalar_lea.hbm %s2326_s0, 2560 }
   0x2   :  { %s14_s10 = sshll.u32 %s2065_s9, 4  ;;  %p2018_p0 = scmp.ne.s32.totalorder %s2326_s0, %s2017_s13  ;;  %s15_s10 = int_to_ptr.vmem [resolvable:$true] %s14_s10 }
   0x3   :  { %p2021_p1 = scmp.lt.u32.totalorder %s2017_s13, %s2326_s0 }
   0x5   :  { %p2023_p2 = pnand %p2021_p1, %p2018_p0 }
   0x7   :  { %2026 = shalt.err (!%p2023_p2)
}
   0x8   :  { %s2027_s18 = scalar_lea.vmem %s15_s10, 2560  ;;  %p2032_p4 = scmp.lt.s32.totalorder %s15_s10, %s15_s10 }
   0x9   :  { %p2028_p3 = scmp.ne.s32.totalorder %s15_s10, %s2027_s18  ;;  %p2033_p5 = scmp.lt.s32.totalorder %s2027_s18, %s2027_s18 }
   0xb   :  { %p2034_p6 = por %p2033_p5, %p2032_p4 }
   0xd   :  { %p2035_p7 = pnand %p2034_p6, %p2028_p3 }
   0xf   :  { %2038 = shalt.err (!%p2035_p7)
}
  0x10   :  { %s2066_s19 = smov 128   ;;  %s2067_s20 = smov 8  }
  0x11   :  { %20 = dma.hbm_to_vmem [thread:$0]  %s2326_s0, 2560, %s15_s10, [#allocation3], %s2066_s19, %s2066_s19, %s2067_s20  }
  0x12   :  { %s2068_s23 = smov [#allocation4]   ;;  %s2039_s27 = scalar_lea.hbm %s2327_s1, 256 }
  0x13   :  { %s26_s24 = sshll.u32 %s2068_s23, 4  ;;  %p2040_p8 = scmp.ne.s32.totalorder %s2327_s1, %s2039_s27  ;;  %s27_s24 = int_to_ptr.vmem [resolvable:$true] %s26_s24 }
  0x14   :  { %p2043_p9 = scmp.lt.u32.totalorder %s2039_s27, %s2327_s1 }
  0x16   :  { %p2045_p10 = pnand %p2043_p9, %p2040_p8 }
  0x18   :  { %2048 = shalt.err (!%p2045_p10)
}
  0x19   :  { %s2049_s4 = scalar_lea.vmem %s27_s24, 256  ;;  %p2054_p12 = scmp.lt.s32.totalorder %s27_s24, %s27_s24 }
  0x1a   :  { %p2050_p11 = scmp.ne.s32.totalorder %s27_s24, %s2049_s4  ;;  %p2055_p13 = scmp.lt.s32.totalorder %s2049_s4, %s2049_s4 }
  0x1c   :  { %p2056_p0 = por %p2055_p13, %p2054_p12 }
  0x1e   :  { %p2057_p1 = pnand %p2056_p0, %p2050_p11 }
  0x20   :  { %2060 = shalt.err (!%p2057_p1)
}
  0x21   :  { %32 = dma.hbm_to_vmem [thread:$0]  %s2327_s1, 256, %s27_s24, [#allocation5], %s2066_s19, %s2066_s19, %s2067_s20  }
  0x22   :  { %2061 = dma.done.wait [#allocation3], 2560  }
  0x23   :  { %2062 = vsyncadd [#allocation3], 4294964736 }
  0x24   :  { %2063 = dma.done.wait [#allocation5], 256  }
  0x25   :  { %2064 = vsyncadd [#allocation5], 4294967040  ;;  %vm105_vm0 = vcmask 97280   ;;  %v96_v1 = vld [vmem:[#allocation2 + $0x30] sm:$0xff]  ;;  %v97_v2 = vld [vmem:[#allocation2 + $0x38] sm:$0xff]  ;;  %vm81_vm2 = vcmask 130048  }
  0x26   :  { %vm2113_vm1 = vmpackc.low %vm105_vm0, %vm105_vm0  ;;  %v98_v3 = vld [vmem:[#allocation2 + $0x40] sm:$0xff]  ;;  %v1911_v4 = vpack.c.bf16 %v97_v2, %v96_v1  ;;  %v99_v5 = vld [vmem:[#allocation2 + $0x48] sm:$0xff]  ;;  %vm284_vm3 = vcmask 261120   ;;  %v2069_v42 = vmov 0.0   ;;  %vm2071_vm9 = vmmov 0  }
  0x27   :  { %v94_v6 = vld [vmem:[#allocation2 + $0x20] sm:$0xff]  ;;  %v1917_v7 = vpack.c.bf16 %v99_v5, %v98_v3  ;;  %v48_v9 = vld [vmem:[#allocation2 + $0x8] sm:$0xff]  ;;  %v313_v35 = vld [vmem:[#allocation2 + $0x50] sm:$0xff]  ;;  %39 = vst [vmem:[%s2328_s2] sm:$0xff] %v2069_v42  ;;  %vm591_vm10 = vcmask 64512  }
  0x28   :  { %1807 = vmatprep.mubr.msk.f32.mxu0 %vm105_vm0, %v94_v6  ;;  %v47_v8 = vld [vmem:[#allocation2] sm:$0xff]  ;;  %1913 = vmatprep.subr.msk.bf16.mxu0 %vm2113_vm1, %v1911_v4  ;;  %v95_v10 = vld [vmem:[#allocation2 + $0x28] sm:$0xff]  ;;  %v314_v36 = vld [vmem:[#allocation2 + $0x58] sm:$0xff]  ;;  %40 = vst [vmem:[%s2328_s2 + $0x8] sm:$0xff] %v2069_v42 }
  0x29   :  { %49 = vxpose.xlu0.b32.start [1/2] (short) (narrow) %v47_v8, 16  ;;  %1916 = vmatpush3.bf16.xpose.msk.msra.mxu0 %vm2113_vm1, %v1911_v4  ;;  %v1698_v15 = vld [vmem:[#allocation4] ss:$0 sm:$0xff]  ;;  %v1927_v37 = vpack.c.bf16 %v314_v36, %v313_v35  ;;  %vm2151_vm4 = vmpackc.low %vm284_vm3, %vm284_vm3  ;;  %v316_v40 = vld [vmem:[#allocation2 + $0x68] sm:$0xff]  ;;  %41 = vst [vmem:[%s2328_s2 + $0x10] sm:$0xff] %v2069_v42 }
  0x2a   :  { %1919 = vmatprep.subr.msk.bf16.mxu0 %vm2113_vm1, %v1917_v7  ;;  %v315_v39 = vld [vmem:[#allocation2 + $0x60] sm:$0xff]  ;;  %42 = vst [vmem:[%s2328_s2 + $0x18] sm:$0xff] %v2069_v42  ;;  %43 = vst [vmem:[%s2328_s2 + $0x20] sm:$0xff] %v2069_v42  ;;  %v317_v3 = vld [vmem:[#allocation2 + $0x70] sm:$0xff] }
  0x2b   :  { %v1933_v41 = vpack.c.bf16 %v316_v40, %v315_v39  ;;  %44 = vst [vmem:[%s2328_s2 + $0x28] sm:$0xff] %v2069_v42  ;;  %45 = vst [vmem:[%s2328_s2 + $0x30] sm:$0xff] %v2069_v42  ;;  %v1707_v61 = vld [vmem:[#allocation4 + $0x1] ss:$0 sm:$0xff] }
  0x2c   :  { %46 = vst [vmem:[%s2328_s2 + $0x38] sm:$0xff] %v2069_v42  ;;  %vm1945_vm11 = vmpackc.low %vm591_vm10, %vm591_vm10 }
  0x2d   :  { %50 = vxpose.xlu0.b32.end [2/2] (short) (narrow) %v48_v9, 16  ;;  %v2070_v9 = vmov 0.0|0.0  }
  0x31   :  { %1922 = vmatpush3.bf16.xpose.msk.msra.mxu0 %vm2113_vm1, %v1917_v7 }
  0x38   :  { %1808 = vmatmul.mubr.msk.f32.vlgmr.msra.gmra.mrb[0].mxu0 %vm105_vm0, %v95_v10  ;;  %v1716_v10 = vld [vmem:[#allocation4 + $0x2] ss:$0 sm:$0xff] }
  0xa9   :  { %v2127_v11 = vpop.trf.xlu0 }
  0xaa   :  { %1814 = vmatprep.mubr.msk.f32.mxu1 %vm81_vm2, %v2127_v11  ;;  %1832 = vmatprep.mubr.msk.f32.mxu0 %vm81_vm2, %v2127_v11  ;;  %v82_v12 = vsel %vm81_vm2, %v2127_v11, 0.0  ;;  %vm695_vm14 = vcmp.gt.f32.partialorder %v2127_v11, 0.0 }
  0xab   :  { %83 = vadd.xlane.f32.xlu1 %v82_v12 }
  0xad   :  { %v2135_v13 = vpop.trf.xlu0 }
  0xae   :  { %v85_v14 = vsel %vm81_vm2, %v2135_v13, 0.0  ;;  %vm696_vm15 = vcmp.gt.f32.partialorder %v2135_v13, 0.0 }
  0xaf   :  { %86 = vadd.xlane.f32.xlu1 %v85_v14 }
 0x10b   :  { %v1809_v16 = vpop.f32.mrb[0].mxu0 }
 0x10c   :  { %v196_v17 = vadd.f32 %v1809_v16, %v1698_v15  ;;  %v190_v18 = vpop.f32.mrb[1].mxu0  ;;  %v1720_v16 = vld [vmem:[#allocation4 + $0x4] ss:$0 sm:$0xff] }
 0x10d   :  { %v191_v19 = vadd.f32 %v1698_v15, %v190_v18 }
 0x10f   :  { %v1923_v20 = vpack.c.bf16 %v196_v17, %v191_v19 }
 0x111   :  { %1924 = vmatprep.subr.bf16.mxu1 %v1923_v20 }
 0x112   :  { %1926 = vmatpush3.bf16.msra.mxu1 %v1923_v20 }
 0x113   :  { %1929 = vmatprep.subr.msk.bf16.mxu1 %vm2151_vm4, %v1927_v37 }
 0x115   :  { %1815 = vmatmul.mubr.msk.f32.vlgmr.msra.gmra.mrb[0].mxu1 %vm81_vm2, %v2135_v13 }
 0x11b   :  { %1932 = vmatpush3.bf16.xpose.msk.msra.mxu1 %vm2151_vm4, %v1927_v37 }
 0x11c   :  { %1935 = vmatprep.subr.msk.bf16.mxu1 %vm2151_vm4, %v1933_v41 }
 0x123   :  { %1938 = vmatpush3.bf16.xpose.msk.msra.mxu1 %vm2151_vm4, %v1933_v41 }
 0x124   :  { %1943 = vmatprep.subr.bf16.mxu1 %v2070_v9 }
 0x138   :  { %v84_v21 = vpop.xlane.xlu1 %83 }
 0x139   :  { %v88_v24 = vmax.f32 %v84_v21, 1.0 }
 0x13c   :  { %v87_v22 = vpop.xlane.xlu1 %86 }
 0x13d   :  { %v89_v23 = vmax.f32 %v87_v22, 1.0 }
 0x13f   :  { %1979 = vrcp.f32 %v89_v23  ;;  %v320_v23 = vld [vmem:[#allocation4 + $0x3] sm:$0x1] }
 0x140   :  { %1981 = vrcp.f32 %v88_v24  ;;  %v322_v24 = vld [vmem:[#allocation4 + $0x5] sm:$0x1] }
 0x141   :  { %1968 = vpush %v322_v24 }
 0x149   :  { %v2141_v25 = vpop.eup %1979 }
 0x14a   :  { %v2143_v27 = vpop.eup %1981 }
 0x172   :  { %s1969_s25 = spop %1968 }
 0x1e8   :  { %v1816_v26 = vpop.f32.mrb[0].mxu1 }
 0x1e9   :  { %v281_v28 = vmul.f32 %v2141_v25, %v1816_v26  ;;  %v271_v29 = vpop.f32.mrb[1].mxu1 }
 0x1ea   :  { %v280_v30 = vmul.f32 %v2143_v27, %v271_v29 }
 0x1eb   :  { %v283_v31 = vmul.f32 %v281_v28, %v281_v28 }
 0x1ec   :  { %v282_v32 = vmul.f32 %v280_v30, %v280_v30 }
 0x1ed   :  { %v288_v33 = vsel %vm284_vm3, %v283_v31, 0.0 }
 0x1ee   :  { %289 = vadd.xlane.f32.xlu1 %v288_v33  ;;  %v285_v34 = vsel %vm284_vm3, %v282_v32, 0.0  ;;  %v685_v33 = vstv %s1969_s25 }
 0x1ef   :  { %286 = vadd.xlane.f32.xlu0 %v285_v34 }
 0x27b   :  { %v290_v43 = vpop.xlane.xlu1 %289 }
 0x27c   :  { %1983 = vrsqrt.f32 %v290_v43  ;;  %v287_v44 = vpop.xlane.xlu0 %286  ;;  %vm300_vm5 = vcmp.eq.f32.partialorder %v290_v43, inf  ;;  %v303_v48 = vand.u32 2147483648, %v290_v43  ;;  %vm302_vm6 = vcmp.eq.f32.partialorder %v290_v43, 0.0 }
 0x27d   :  { %1985 = vrsqrt.f32 %v287_v44  ;;  %vm293_vm7 = vcmp.eq.f32.partialorder %v287_v44, inf  ;;  %v296_v51 = vand.u32 2147483648, %v287_v44  ;;  %vm295_vm8 = vcmp.eq.f32.partialorder %v287_v44, 0.0 }
 0x286   :  { %v1984_v45 = vpop.eup %1983 }
 0x287   :  { %v1986_v46 = vpop.eup %1985  ;;  %v299_v47 = vmul.f32 %v1984_v45, %v290_v43 }
 0x288   :  { %v292_v49 = vmul.f32 %v1986_v46, %v287_v44 }
 0x289   :  { %v301_v50 = vsel %vm300_vm5, %v290_v43, %v299_v47  ;;  %vm1676_vm5 = vcmask 257024  }
 0x28a   :  { %v304_v52 = vsel %vm302_vm6, %v303_v48, %v301_v50  ;;  %v294_v53 = vsel %vm293_vm7, %v287_v44, %v292_v49  ;;  %vm1681_vm6 = vcmask 1043456   ;;  %vm1690_vm7 = vcmask 0  }
 0x28b   :  { %v306_v54 = vmax.f32 %v304_v52, 1e-12  ;;  %v297_v55 = vsel %vm295_vm8, %v296_v51, %v294_v53 }
 0x28c   :  { %v305_v56 = vmax.f32 %v297_v55, 1e-12 }
 0x28d   :  { %1987 = vrcp.f32 %v306_v54 }
 0x28e   :  { %1989 = vrcp.f32 %v305_v56 }
 0x297   :  { %v1988_v57 = vpop.eup %1987 }
 0x298   :  { %v1990_v58 = vpop.eup %1989  ;;  %v310_v59 = vmul.f32 %v1988_v57, %v281_v28 }
 0x299   :  { %v309_v60 = vmul.f32 %v1990_v58, %v280_v30 }
 0x29a   :  { %312 = vst.msk [vmem:[%s2328_s2 + $0x8] sm:$0xff] %vm284_vm3, %v310_v59 }
 0x29b   :  { %311 = vst.msk [vmem:[%s2328_s2] sm:$0xff] %vm284_vm3, %v309_v60  ;;  %1825 = vmatprep.mubr.msk.f32.mxu1 %vm284_vm3, %v309_v60 }
 0x29c   :  { %1826 = vmatmul.mubr.msk.f32.vlgmr.msra.gmra.mrb[2].mxu1 %vm284_vm3, %v310_v59 }
 0x29d   :  { %1844 = vmatprep.mubr.msk.f32.mxu1 %vm2071_vm9, %v2069_v42 }
 0x36f   :  { %v1827_v62 = vpop.f32.mrb[2].mxu1 }
 0x370   :  { %v417_v63 = vadd.f32 %v1827_v62, %v1707_v61  ;;  %v411_v0 = vpop.f32.mrb[3].mxu1 }
 0x371   :  { %v412_v1 = vadd.f32 %v1707_v61, %v411_v0 }
 0x373   :  { %v1939_v2 = vpack.c.bf16 %v417_v63, %v412_v1 }
 0x375   :  { %1940 = vmatprep.subr.bf16.mxu0 %v1939_v2 }
 0x376   :  { %1942 = vmatpush3.bf16.msra.mxu0 %v1939_v2 }
 0x377   :  { %1835 = vmatprep.subr.msk.mxu0 %vm284_vm3, %v317_v3 }
 0x379   :  { %1833 = vmatmul.mubr.msk.f32.vlgmr.msra.gmra.mrb[2].mxu0 %vm81_vm2, %v2135_v13 }
 0x37f   :  { %1836 = vmatpush3.xpose.msk.msra.mxu0 %vm284_vm3, %v317_v3 }
 0x44c   :  { %v1834_v4 = vpop.f32.mrb[2].mxu0 }
 0x44d   :  { %v2210_v5 = vmul.f32 %v2141_v25, %v1834_v4  ;;  %v486_v6 = vpop.f32.mrb[3].mxu0  ;;  %v677_v25 = vlaneseq }
 0x44e   :  { %v2213_v7 = vmul.f32 %v2143_v27, %v486_v6 }
 0x44f   :  { %v2234_v26 = vshrl.u32 %v677_v25, 7  ;;  %v1075_v38 = vand.u32 127, %v677_v25 }
 0x450   :  { %v1952_v8 = vpack.c.bf16 %v2210_v5, %v2213_v7  ;;  %1837 = vmatprep.mubr.msk.f32.mxu0 %vm284_vm3, %v2213_v7 }
 0x451   :  { %1838 = vmatmul.mubr.msk.f32.vlgmr.msra.gmra.mrb[4].mxu0 %vm284_vm3, %v2210_v5  ;;  %v679_v28 = vsub.s32 0, %v2234_v26  ;;  %vm1076_vm0 = vcmp.ne.s32.totalorder %v2234_v26, %v1075_v38 }
 0x524   :  { %v1839_v12 = vpop.f32.mrb[4].mxu0 }
 0x525   :  { %v582_v14 = vadd.f32 %v1839_v12, %v1716_v10  ;;  %v576_v15 = vpop.f32.mrb[5].mxu0 }
 0x526   :  { %v577_v17 = vadd.f32 %v1716_v10, %v576_v15  ;;  %v92_v15 = vld [vmem:[#allocation2 + $0x10] sm:$0xff] }
 0x527   :  { %v590_v21 = vmul.f32 %v1720_v16, %v582_v14 }
 0x528   :  { %v1944_v18 = vpack.c.bf16 %v582_v14, %v577_v17  ;;  %v589_v19 = vmul.f32 %v1720_v16, %v577_v17  ;;  %v93_v16 = vld [vmem:[#allocation2 + $0x18] sm:$0xff] }
 0x529   :  { %v595_v22 = vsel %vm591_vm10, %v590_v21, 0.0  ;;  %v1955_v17 = vpack.c.bf16 %v93_v16, %v92_v15 }
 0x52a   :  { %1946 = vmatpush3.bf16.xpose.msk.msra.mxu1 %vm1945_vm11, %v1944_v18  ;;  %1948 = vmatprep.subr.bf16.mxu0 %v1944_v18  ;;  %v592_v20 = vsel %vm591_vm10, %v589_v19, 0.0 }
 0x52b   :  { %1950 = vmatpush3.bf16.msra.mxu0 %v1944_v18  ;;  %593 = vadd.xlane.f32.xlu1 %v592_v20 }
 0x52c   :  { %1951 = vmatprep.subr.bf16.mxu0 %v2070_v9  ;;  %1954 = vmatprep.subr.bf16.mxu1 %v2070_v9 }
 0x52f   :  { %596 = vadd.xlane.f32.xlu1 %v595_v22 }
 0x531   :  { %1845 = vmatmul.mubr.msk.f32.vlgmr.msra.gmra.mrb[4].mxu1 %vm591_vm10, %v320_v23 }
 0x532   :  { %1865 = vmatprep.mubr.msk.f32.mxu1 %vm2071_vm9, %v2069_v42  ;;  %1956 = vmatpush3.bf16.msra.mxu1 %v1955_v17 }
 0x533   :  { %1960 = vmatprep.subr.bf16.mxu1 %v2070_v9 }
 0x5b8   :  { %v594_v27 = vpop.xlane.xlu1 %593 }
 0x5bc   :  { %v597_v32 = vpop.xlane.xlu1 %596 }
 0x604   :  { %v673_v29 = vpop.f32.mrb[4].mxu1 }
 0x605   :  { %v680_v30 = vrot.slane %v673_v29, %v679_v28  ;;  %v1846_v31 = vpop.f32.mrb[5].mxu1  ;;  %v1123_v29 = vld [vmem:[#allocation2 + $0x80] sm:$0xff] }
 0x607   :  { %v681_v34 = vadd.f32 %v680_v30, %v594_v27  ;;  %v682_v35 = vadd.f32 %v680_v30, %v597_v32  ;;  %v1122_v27 = vld [vmem:[#allocation2 + $0x78] sm:$0xff]  ;;  %v1124_v32 = vld [vmem:[#allocation2 + $0x88] sm:$0xff] }
 0x608   :  { %v1961_v30 = vpack.c.bf16 %v1123_v29, %v1122_v27 }
 0x609   :  { %v687_v36 = vadd.f32 %v685_v33, %v681_v34  ;;  %v688_v37 = vadd.f32 %v685_v33, %v682_v35  ;;  %v1125_v33 = vld [vmem:[#allocation2 + $0x90] sm:$0xff] }
 0x60a   :  { %v1965_v34 = vpack.c.bf16 %v1125_v33, %v1124_v32 }
 0x60b   :  { %v691_v39 = vmul.f32 0.01, %v687_v36  ;;  %v692_v40 = vmul.f32 0.01, %v688_v37  ;;  %vm689_vm12 = vcmp.gt.f32.partialorder %v687_v36, 0.0  ;;  %vm690_vm13 = vcmp.gt.f32.partialorder %v688_v37, 0.0 }
 0x60d   :  { %v693_v41 = vsel %vm689_vm12, %v687_v36, %v691_v39  ;;  %v694_v43 = vsel %vm690_vm13, %v688_v37, %v692_v40  ;;  %v1730_v39 = vld [vmem:[#allocation4 + $0x6] ss:$0 sm:$0xff] }
 0x60e   :  { %v697_v44 = vsel %vm695_vm14, %v693_v41, -1e+30  ;;  %v698_v46 = vsel %vm696_vm15, %v694_v43, -1e+30 }
 0x60f   :  { %v699_v45 = vsel %vm81_vm2, %v697_v44, -inf  ;;  %v702_v47 = vsel %vm81_vm2, %v698_v46, -inf }
 0x610   :  { %700 = vmax.xlane.f32.xlu1 %v699_v45 }
 0x614   :  { %703 = vmax.xlane.f32.xlu1 %v702_v47 }
 0x69d   :  { %v701_v48 = vpop.xlane.xlu1 %700 }
 0x69e   :  { %v705_v49 = vsub.f32 %v697_v44, %v701_v48 }
 0x6a0   :  { %v707_v50 = vmul.f32 1.442695, %v705_v49 }
 0x6a1   :  { %v704_v51 = vpop.xlane.xlu1 %703 }
 0x6a2   :  { %1991 = vpow2.f32 %v707_v50  ;;  %v706_v52 = vsub.f32 %v698_v46, %v704_v51  ;;  %v1126_v50 = vld [vmem:[#allocation2 + $0x98] sm:$0xf] }
 0x6a4   :  { %v709_v53 = vmul.f32 1.442695, %v706_v52 }
 0x6a6   :  { %1993 = vpow2.f32 %v709_v53 }
 0x6ac   :  { %v1992_v11 = vpop.eup %1991 }
 0x6ad   :  { %v711_v54 = vsel %vm81_vm2, %v1992_v11, 0.0 }
 0x6ae   :  { %712 = vadd.xlane.f32.xlu1 %v711_v54 }
 0x6b0   :  { %v1994_v55 = vpop.eup %1993 }
 0x6b1   :  { %v714_v13 = vsel %vm81_vm2, %v1994_v55, 0.0 }
 0x6b2   :  { %715 = vadd.xlane.f32.xlu1 %v714_v13  ;;  %v1737_v13 = vld [vmem:[#allocation4 + $0x7] ss:$0 sm:$0xff] }
 0x73b   :  { %v713_v56 = vpop.xlane.xlu1 %712 }
 0x73c   :  { %1995 = vrcp.f32 %v713_v56 }
 0x73f   :  { %v716_v57 = vpop.xlane.xlu1 %715 }
 0x740   :  { %1997 = vrcp.f32 %v716_v57  ;;  %v1740_v57 = vld [vmem:[#allocation4 + $0x9] ss:$0 sm:$0xff] }
 0x746   :  { %v1996_v58 = vpop.eup %1995 }
 0x747   :  { %v719_v59 = vmul.f32 %v1996_v58, %v1992_v11 }
 0x749   :  { %1851 = vmatprep.mubr.msk.f32.mxu0 %vm81_vm2, %v719_v59 }
 0x74a   :  { %v1998_v60 = vpop.eup %1997 }
 0x74b   :  { %v720_v61 = vmul.f32 %v1998_v60, %v1994_v55  ;;  %v1129_v60 = vld [vmem:[#allocation4 + $0x8] sm:$0x1] }
 0x74d   :  { %1852 = vmatmul.mubr.msk.f32.vlgmr.msra.gmra.mrb[6].mxu0 %vm81_vm2, %v720_v61 }
 0x74e   :  { %1953 = vmatpush3.bf16.msra.mxu0 %v1952_v8  ;;  %1858 = vmatprep.mubr.msk.f32.mxu0 %vm2071_vm9, %v2069_v42 }
 0x74f   :  { %1957 = vmatprep.subr.bf16.mxu0 %v2070_v9 }
 0x820   :  { %v1853_v62 = vpop.f32.mrb[6].mxu0 }
 0x821   :  { %v793_v63 = vpop.f32.mrb[7].mxu0  ;;  %v805_v1 = vsel %vm591_vm10, %v1853_v62, -inf }
 0x822   :  { %v802_v0 = vsel %vm591_vm10, %v793_v63, -inf }
 0x823   :  { %803 = vmax.xlane.f32.xlu1 %v802_v0 }
 0x827   :  { %806 = vmax.xlane.f32.xlu1 %v805_v1 }
 0x8b0   :  { %v804_v2 = vpop.xlane.xlu1 %803 }
 0x8b1   :  { %v808_v3 = vsub.f32 %v793_v63, %v804_v2  ;;  %v1131_v63 = vld [vmem:[#allocation4 + $0xa] sm:$0x1] }
 0x8b2   :  { %1970 = vpush %v1131_v63 }
 0x8b3   :  { %v810_v4 = vmul.f32 1.442695, %v808_v3 }
 0x8b4   :  { %v807_v6 = vpop.xlane.xlu1 %806 }
 0x8b5   :  { %1999 = vpow2.f32 %v810_v4  ;;  %v809_v5 = vsub.f32 %v1853_v62, %v807_v6 }
 0x8b7   :  { %v812_v7 = vmul.f32 1.442695, %v809_v5 }
 0x8b9   :  { %2001 = vpow2.f32 %v812_v7 }
 0x8bf   :  { %v2000_v8 = vpop.eup %1999 }
 0x8c0   :  { %v814_v10 = vsel %vm591_vm10, %v2000_v8, 0.0 }
 0x8c1   :  { %815 = vadd.xlane.f32.xlu1 %v814_v10 }
 0x8c3   :  { %v2002_v12 = vpop.eup %2001 }
 0x8c4   :  { %v817_v14 = vsel %vm591_vm10, %v2002_v12, 0.0 }
 0x8c5   :  { %818 = vadd.xlane.f32.xlu1 %v817_v14 }
 0x8e3   :  { %s1971_s4 = spop %1970 }
 0x8e4   :  { %v1467_v4 = vstv %s1971_s4 }
 0x94e   :  { %v816_v18 = vpop.xlane.xlu1 %815 }
 0x94f   :  { %2003 = vrcp.f32 %v816_v18 }
 0x952   :  { %v819_v19 = vpop.xlane.xlu1 %818 }
 0x953   :  { %2005 = vrcp.f32 %v819_v19 }
 0x959   :  { %v2004_v20 = vpop.eup %2003 }
 0x95a   :  { %v822_v21 = vmul.f32 %v2004_v20, %v2000_v8 }
 0x95c   :  { %824 = vxpose.xlu1.b32.start [1/2] (short) (narrow) %v822_v21, 8  ;;  %1078 = vst.msk [vmem:[%s2328_s2 + $0x10] sm:$0xff] %vm591_vm10, %v822_v21 }
 0x95d   :  { %v2006_v22 = vpop.eup %2005 }
 0x95e   :  { %v823_v23 = vmul.f32 %v2006_v22, %v2002_v12 }
 0x960   :  { %825 = vxpose.xlu1.b32.end [2/2] (short) (narrow) %v823_v23, 8  ;;  %1079 = vst.msk [vmem:[%s2328_s2 + $0x18] sm:$0xff] %vm591_vm10, %v823_v23  ;;  %v1958_v24 = vpack.c.bf16 %v823_v23, %v822_v21 }
 0x9dc   :  { %v840_v31 = vpop.trf.xlu1 }
 0x9dd   :  { %1859 = vmatmul.mubr.msk.f32.vlgmr.msra.gmra.mrb[8].mxu0 %vm81_vm2, %v840_v31  ;;  %1866 = vmatmul.mubr.msk.f32.vlgmr.msra.gmra.mrb[6].mxu1 %vm81_vm2, %v840_v31 }
 0x9de   :  { %1959 = vmatpush3.bf16.msra.mxu0 %v1958_v24  ;;  %1963 = vmatpush3.bf16.xpose.msk.msra.mxu1 %vm2151_vm4, %v1961_v30 }
 0x9df   :  { %1964 = vmatprep.subr.bf16.mxu1 %v2070_v9  ;;  %1872 = vmatprep.mubr.msk.f32.mxu0 %vm2071_vm9, %v2069_v42 }
 0x9e0   :  { %1883 = vmatprep.mubr.msk.f32.mxu1 %vm2071_vm9, %v2069_v42  ;;  %1886 = vmatprep.subr.mxu0 %v2069_v42 }
 0x9e6   :  { %1967 = vmatpush3.bf16.xpose.msk.msra.mxu1 %vm2151_vm4, %v1965_v34 }
 0x9e7   :  { %1906 = vmatprep.subr.mxu1 %v2069_v42 }
 0xab0   :  { %v925_v35 = vpop.f32.mrb[8].mxu0  ;;  %v995_v36 = vpop.f32.mrb[6].mxu1 }
 0xab1   :  { %1080 = vst.msk [vmem:[%s2328_s2 + $0x20] sm:$0xff] %vm284_vm3, %v925_v35  ;;  %v1860_v9 = vpop.f32.mrb[9].mxu0  ;;  %v1867_v37 = vpop.f32.mrb[7].mxu1  ;;  %1873 = vmatmul.mubr.msk.f32.vlgmr.msra.gmra.mrb[10].mxu0 %vm81_vm2, %v995_v36  ;;  %1884 = vmatmul.mubr.msk.f32.vlgmr.msra.gmra.mrb[8].mxu1 %vm284_vm3, %v925_v35  ;;  %vm1380_vm2 = vcmask 31744  }
 0xab2   :  { %1888 = vmatprep.mubr.msk.f32.mxu0 %vm2071_vm9, %v2069_v42  ;;  %1908 = vmatprep.mubr.msk.f32.mxu1 %vm2071_vm9, %v2069_v42 }
 0xb84   :  { %v1068_v40 = vpop.f32.mrb[10].mxu0  ;;  %v1217_v41 = vpop.f32.mrb[8].mxu1 }
 0xb85   :  { %v1077_v43 = vsel %vm1076_vm0, %v1068_v40, 0.0  ;;  %v1218_v44 = vadd.f32 %v1730_v39, %v1217_v41  ;;  %v1874_v45 = vpop.f32.mrb[11].mxu0  ;;  %v1885_v46 = vpop.f32.mrb[9].mxu1 }
 0xb86   :  { %1081 = vxpose.xlu0.b32.start.end [1/1] (short) (narrow) %v1077_v43, 8 }
 0xb87   :  { %1887 = vmatpush3.msra.mxu0 %v1218_v44 }
 0xb88   :  { %1891 = vmatprep.subr.mxu0 %v2069_v42 }
 0xc06   :  { %v1097_v47 = vpop.trf.xlu0 }
 0xc07   :  { %vm1113_vm1 = vcmp.ne.f32.partialorder %v1097_v47, 0.0 }
 0xc08   :  { %v1729_v48 = vsel %vm1113_vm1, 1.0, %v2069_v42 }
 0xc09   :  { %v1116_v49 = vsel %vm1076_vm0, %v1729_v48, 1.0 }
 0xc0a   :  { %1889 = vmatmul.mubr.msk.f32.vlgmr.msra.gmra.mrb[12].mxu0 %vm591_vm10, %v1116_v49  ;;  %v1117_v25 = vsel %vm591_vm10, %v1116_v49, 0.0  ;;  %vm1473_vm4 = vcmp.gt.f32.partialorder %v1116_v49, 0.0 }
 0xc0b   :  { %1118 = vadd.xlane.f32.xlu0 %v1117_v25  ;;  %1893 = vmatprep.mubr.msk.f32.mxu0 %vm2071_vm9, %v2069_v42 }
 0xc0c   :  { %1892 = vmatpush3.xpose.msk.msra.mxu0 %vm284_vm3, %v1126_v50 }
 0xc0d   :  { %1896 = vmatprep.subr.mxu0 %v2069_v42 }
 0xc98   :  { %v1119_v51 = vpop.xlane.xlu0 %1118 }
 0xc99   :  { %v1120_v52 = vmax.f32 %v1119_v51, 1.0 }
 0xc9b   :  { %2007 = vrcp.f32 %v1120_v52 }
 0xca5   :  { %v2008_v53 = vpop.eup %2007 }
 0xcdd   :  { %v1290_v11 = vpop.f32.mrb[12].mxu0 }
 0xcde   :  { %v1294_v54 = vmul.f32 %v2008_v53, %v1290_v11  ;;  %v1890_v55 = vpop.f32.mrb[13].mxu0 }
 0xce0   :  { %1894 = vmatmul.mubr.msk.f32.vlgmr.msra.gmra.mrb[14].mxu0 %vm284_vm3, %v1294_v54  ;;  %1907 = vmatpush3.msra.mxu1 %v1294_v54 }
 0xce1   :  { %1898 = vmatprep.mubr.msk.f32.mxu0 %vm2071_vm9, %v2069_v42 }
 0xdb3   :  { %v1371_v56 = vpop.f32.mrb[14].mxu0 }
 0xdb4   :  { %v1372_v58 = vadd.f32 %v1737_v13, %v1371_v56  ;;  %v1895_v59 = vpop.f32.mrb[15].mxu0 }
 0xdb6   :  { %1897 = vmatpush3.xpose.msk.msra.mxu0 %vm1380_vm2, %v1372_v58  ;;  %v1379_v61 = vmul.f32 %v1740_v57, %v1372_v58 }
 0xdb7   :  { %1901 = vmatprep.subr.mxu0 %v2069_v42 }
 0xdb8   :  { %v1381_v62 = vsel %vm1380_vm2, %v1379_v61, 0.0 }
 0xdb9   :  { %1899 = vmatmul.mubr.msk.f32.vlgmr.msra.gmra.mrb[16].mxu0 %vm1380_vm2, %v1129_v60  ;;  %1382 = vadd.xlane.f32.xlu1 %v1381_v62 }
 0xdba   :  { %1902 = vmatpush3.msra.mxu0 %v1372_v58  ;;  %1903 = vmatprep.mubr.msk.f32.mxu0 %vm2071_vm9, %v2069_v42 }
 0xe46   :  { %v1383_v3 = vpop.xlane.xlu1 %1382 }
 0xe8c   :  { %v1456_v0 = vpop.f32.mrb[16].mxu0 }
 0xe8d   :  { %v1463_v1 = vrot.slane %v1456_v0, %v679_v28  ;;  %v1900_v2 = vpop.f32.mrb[17].mxu0 }
 0xe8f   :  { %v1464_v6 = vadd.f32 %v1463_v1, %v1383_v3 }
 0xe91   :  { %v1469_v5 = vadd.f32 %v1467_v4, %v1464_v6 }
 0xe93   :  { %v1471_v7 = vmul.f32 0.01, %v1469_v5  ;;  %vm1470_vm3 = vcmp.gt.f32.partialorder %v1469_v5, 0.0 }
 0xe95   :  { %v1472_v8 = vsel %vm1470_vm3, %v1469_v5, %v1471_v7 }
 0xe96   :  { %v1474_v10 = vsel %vm1473_vm4, %v1472_v8, -1e+30 }
 0xe97   :  { %v1475_v12 = vsel %vm591_vm10, %v1474_v10, -inf }
 0xe98   :  { %1476 = vmax.xlane.f32.xlu0 %v1475_v12 }
 0xf25   :  { %v1477_v42 = vpop.xlane.xlu0 %1476 }
 0xf26   :  { %v1478_v14 = vsub.f32 %v1474_v10, %v1477_v42 }
 0xf28   :  { %v1479_v15 = vmul.f32 1.442695, %v1478_v14 }
 0xf2a   :  { %2009 = vpow2.f32 %v1479_v15 }
 0xf34   :  { %v2010_v16 = vpop.eup %2009 }
 0xf35   :  { %v1481_v26 = vsel %vm591_vm10, %v2010_v16, 0.0 }
 0xf36   :  { %1482 = vadd.xlane.f32.xlu1 %v1481_v26 }
 0xfc3   :  { %v1483_v28 = vpop.xlane.xlu1 %1482 }
 0xfc4   :  { %2011 = vrcp.f32 %v1483_v28 }
 0xfce   :  { %v2012_v17 = vpop.eup %2011 }
 0xfcf   :  { %v1485_v18 = vmul.f32 %v2012_v17, %v2010_v16 }
 0xfd1   :  { %1904 = vmatmul.mubr.msk.f32.vlgmr.msra.gmra.mrb[18].mxu0 %vm591_vm10, %v1485_v18 }
0x10a4   :  { %v1555_v19 = vpop.f32.mrb[18].mxu0 }
0x10a5   :  { %v1905_v20 = vpop.f32.mrb[19].mxu0  ;;  %v1559_v21 = vsel %vm1380_vm2, %v1555_v19, -inf }
0x10a6   :  { %1560 = vmax.xlane.f32.xlu0 %v1559_v21 }
0x1133   :  { %v1561_v22 = vpop.xlane.xlu0 %1560 }
0x1134   :  { %v1562_v23 = vsub.f32 %v1555_v19, %v1561_v22 }
0x1136   :  { %v1563_v24 = vmul.f32 1.442695, %v1562_v23 }
0x1138   :  { %2013 = vpow2.f32 %v1563_v24 }
0x1142   :  { %v2014_v27 = vpop.eup %2013 }
0x1143   :  { %v1565_v29 = vsel %vm1380_vm2, %v2014_v27, 0.0 }
0x1144   :  { %1566 = vadd.xlane.f32.xlu1 %v1565_v29 }
0x11d1   :  { %v1567_v30 = vpop.xlane.xlu1 %1566 }
0x11d2   :  { %2015 = vrcp.f32 %v1567_v30 }
0x11dc   :  { %v2016_v31 = vpop.eup %2015 }
0x11dd   :  { %v1569_v32 = vmul.f32 %v2016_v31, %v2014_v27 }
0x11df   :  { %1570 = vxpose.xlu0.b32.start.end [1/1] (short) (narrow) %v1569_v32, 8  ;;  %1675 = vst.msk [vmem:[%s2328_s2 + $0x28] sm:$0xff] %vm1380_vm2, %v1569_v32 }
0x125f   :  { %v1586_v33 = vpop.trf.xlu0 }
0x1260   :  { %1909 = vmatmul.mubr.msk.f32.vlgmr.msra.gmra.mrb[10].mxu1 %vm591_vm10, %v1586_v33 }
0x1333   :  { %v1671_v34 = vpop.f32.mrb[10].mxu1 }
0x1334   :  { %v1910_v35 = vpop.f32.mrb[11].mxu1  ;;  %v1678_v36 = vsel %vm1676_vm5, %v1671_v34, 0.0  ;;  %1677 = vst.msk [vmem:[%s2328_s2 + $0x30] sm:$0xf] %vm1676_vm5, %v1671_v34 }
0x1335   :  { %1679 = vadd.xlane.f32.xlu1 %v1678_v36 }
0x13c2   :  { %v1680_v9 = vpop.xlane.xlu1 %1679 }
0x13c3   :  { %v1682_v37 = vsel %vm1681_vm6, %v1680_v9, 0.0 }
0x13c4   :  { %v1683_v38 = vrot.slane %v1682_v37, 4 }
0x13c6   :  { %v1684_v39 = vadd.f32 %v1683_v38, %v1682_v37 }
0x13c8   :  { %v1685_v40 = vrot.slane %v1684_v39, 2 }
0x13ca   :  { %v1686_v41 = vadd.f32 %v1685_v40, %v1684_v39 }
0x13cc   :  { %v1687_v43 = vrot.slane %v1686_v41, 1 }
0x13ce   :  { %v1688_v44 = vadd.f32 %v1687_v43, %v1686_v41 }
0x13d0   :  { %v1689_v45 = vmul.f32 0.0078125, %v1688_v44 }
0x13d2   :  { %1691 = vst.msk [vmem:[%s2328_s2 + $0x38] sm:$0x1] %vm1690_vm7, %v1689_v45 }
0x13d3   :  { %1696 = vsyncpa [#allocation3], 1 }
0x13d4   :  { %1697 = vsyncpa [#allocation5], 1 }

</bundles_post_ra>
